<compile_context>
chip_gen: v7x
topology: tpu7x:2x2x1
jax: 0.10.0
libtpu: 0.0.40
codegen_flags: <defaults>
</compile_context>

<pallas_src>
import functools

import jax
import jax.numpy as jnp
from jax.experimental import pallas as pl
from jax.experimental.pallas import tpu as pltpu


# --------------------------------------------------------------------------
# Kernel: one GCN propagation  out = act(A @ XW + b)  tiled over (rows, K).
# Accumulates directly into the f32 output block (resident across K).
# --------------------------------------------------------------------------
def _propagate_kernel(a_ref, xw_ref, b_ref, out_ref, *,
                      apply_relu, tk, xw_resident):
    k = pl.program_id(1)

    @pl.when(k == 0)
    def _():
        out_ref[...] = jnp.zeros_like(out_ref)

    if xw_resident:
        # XW slab lives fully in VMEM; slice the current K chunk out of it.
        start = pl.multiple_of(k * tk, tk)
        xw = xw_ref[pl.ds(start, tk), :]
    else:
        xw = xw_ref[...]

    # bf16 x bf16 -> f32 accumulate on the MXU, directly into the out block.
    out_ref[...] += jnp.dot(a_ref[...], xw,
                            preferred_element_type=jnp.float32)

    @pl.when(k == pl.num_programs(1) - 1)
    def _():
        r = out_ref[...] + b_ref[...]          # bias only in finalize branch
        if apply_relu:
            r = jnp.maximum(r, 0.0)
        out_ref[...] = r


# --------------------------------------------------------------------------
# Tiling helpers
# --------------------------------------------------------------------------
def _round_up(x, m):
    return ((x + m - 1) // m) * m


def _pick_row_tile(n, pref, granule=16):
    """Row tile (bf16 sublane granule 16); prefer an EVEN number of row tiles
    so the 'parallel' row axis splits cleanly across v7x's two TensorCores."""
    pref = _round_up(pref, granule)
    if n <= pref:
        t = _round_up(n, granule)
        return t, t
    count = -(-n // pref)                  # ceil
    if count % 2:
        count += 1
    t = _round_up(-(-n // count), granule)
    return t, t * count


def _pick_k_tile(n, pref, granule=128):
    pref = _round_up(pref, granule)
    if n <= pref:
        t = _round_up(n, granule)
        return t, t
    return pref, _round_up(n, pref)


# --------------------------------------------------------------------------
# One propagation pass:  out[:n_real] = act(A_pad @ pad(xw) + bias)
# --------------------------------------------------------------------------
def _propagate(a_pad, n_real, xw, bias_row, *, apply_relu, tm, tk, n_rp, n_kp):
    P = xw.shape[1]                                        # lane-padded width
    xw_p = jnp.zeros((n_kp, P), jnp.bfloat16).at[:n_real].set(
        xw.astype(jnp.bfloat16))

    # Keep the XW operand fully resident in VMEM when it is small enough;
    # this removes the per-row-tile re-fetch (+50% HBM reads at TM=256).
    xw_resident = (n_kp * P * 2) <= (8 << 20)

    grid = (n_rp // tm, n_kp // tk)
    kern = functools.partial(_propagate_kernel, apply_relu=apply_relu,
                             tk=tk, xw_resident=xw_resident)

    if xw_resident:
        xw_spec = pl.BlockSpec((n_kp, P), lambda i, k: (0, 0))   # DMA'd once
        xw_vmem = 2 * n_kp * P * 2
    else:
        xw_spec = pl.BlockSpec((tk, P), lambda i, k: (k, 0))     # K slab stream
        xw_vmem = 2 * tk * P * 2

    # Explicit VMEM budget: double-buffered A tile + XW + out block + bias,
    # plus headroom.  v5e's scoped default is only 16 MiB, so raise it; the
    # default tiling keeps this <= ~28 MiB (fits v7x's 64 MiB physical VMEM).
    vmem_need = (2 * tm * tk * 2) + xw_vmem + (2 * tm * P * 4) + (2 * P * 4)
    vmem_limit = int(min(max(vmem_need + (4 << 20), 32 << 20), 60 << 20))

    refetch = 1 if xw_resident else (n_rp // tm)
    cost = pl.CostEstimate(
        flops=2 * n_rp * n_kp * P,
        transcendentals=0,
        bytes_accessed=(n_rp * n_kp * 2          # A stream (bf16)
                        + refetch * n_kp * P * 2  # XW (once if resident)
                        + P * 4                   # bias
                        + n_rp * P * 4),          # output write
    )

    out = pl.pallas_call(
        kern,
        out_shape=jax.ShapeDtypeStruct((n_rp, P), jnp.float32),
        grid_spec=pltpu.PrefetchScalarGridSpec(
            num_scalar_prefetch=0,
            grid=grid,
            in_specs=[
                pl.BlockSpec((tm, tk), lambda i, k: (i, k)),   # A tile
                xw_spec,                                       # XW
                pl.BlockSpec((1, P), lambda i, k: (0, 0)),     # bias (resident)
            ],
            out_specs=pl.BlockSpec((tm, P), lambda i, k: (i, 0)),
        ),
        compiler_params=pltpu.CompilerParams(
            dimension_semantics=("parallel", "arbitrary"),
            vmem_limit_bytes=vmem_limit,
        ),
        cost_estimate=cost,
    )(a_pad, xw_p, bias_row)
    return out[:n_real]


# --------------------------------------------------------------------------
# Adjacency preparation (do ONCE; A is constant in a GCN) + full forward.
# --------------------------------------------------------------------------
def prepare_adjacency(A, *, row_tile=512, k_tile=4096):
    """Pad + cast A to the streaming layout once; reuse across layers/calls."""
    N = A.shape[0]
    tm, n_rp = _pick_row_tile(N, row_tile, 16)
    tk, n_kp = _pick_k_tile(N, k_tile, 128)
    a_pad = jnp.zeros((n_rp, n_kp), jnp.bfloat16).at[:N, :N].set(
        A.astype(jnp.bfloat16))
    meta = {"n": N, "tm": tm, "tk": tk, "n_rp": n_rp, "n_kp": n_kp}
    return a_pad, meta


def gcn_forward(adj, X, W1, b1, W2, b2):
    """adj = prepare_adjacency(A).  X:(N,F)  W1:(16,F) b1:(16,)
    W2:(C,16) b2:(C,)  ->  (N,C) f32."""
    a_pad, meta = adj
    N, tm, tk = meta["n"], meta["tm"], meta["tk"]
    n_rp, n_kp = meta["n_rp"], meta["n_kp"]

    Hdim = W1.shape[0]
    C = W2.shape[0]
    Hp = _round_up(Hdim, 128)          # lane-dense hidden width
    Cp = _round_up(C, 128)             # lane-dense class width

    # ----- layer 1 (reassociated): H = relu(A @ (X W1^T) + b1) -----
    xw1 = jnp.pad(X @ W1.T, ((0, 0), (0, Hp - Hdim)))          # (N, Hp) f32
    b1p = jnp.pad(b1, (0, Hp - Hdim)).reshape(1, Hp)
    H = _propagate(a_pad, N, xw1, b1p, apply_relu=True,
                   tm=tm, tk=tk, n_rp=n_rp, n_kp=n_kp)         # (N, Hp) f32

    # ----- layer 2 (reassociated): OUT = A @ (H W2^T) + b2 -----
    w2t_p = jnp.zeros((Hp, Cp), jnp.float32).at[:Hdim, :C].set(W2.T)
    hw2 = H @ w2t_p                                            # (N, Cp) f32
    b2p = jnp.pad(b2, (0, Cp - C)).reshape(1, Cp)
    out_p = _propagate(a_pad, N, hw2, b2p, apply_relu=False,
                       tm=tm, tk=tk, n_rp=n_rp, n_kp=n_kp)     # (N, Cp)
    return out_p[:, :C]


# --------------------------------------------------------------------------
# Deterministic init mimicking torch.nn.Linear defaults.
# --------------------------------------------------------------------------
def _linear_init(key, out_features, in_features):
    kw, kb = jax.random.split(key)
    bound = 1.0 / jnp.sqrt(jnp.float32(in_features))
    W = jax.random.uniform(kw, (out_features, in_features), jnp.float32,
                           minval=-bound, maxval=bound)
    b = jax.random.uniform(kb, (out_features,), jnp.float32,
                           minval=-bound, maxval=bound)
    return W, b


if __name__ == "__main__":
    key = jax.random.PRNGKey(0)
    k_a, k_x, k_l1, k_l2 = jax.random.split(key, 4)

    N = 200            # number of nodes (exercises row + K padding)
    num_feature = 48
    hidden = 16        # fixed by the module
    num_class = 7

    # Symmetric normalized-ish adjacency (dense stand-in for the sparse A).
    A_raw = jax.random.uniform(k_a, (N, N), jnp.float32)
    A = (A_raw + A_raw.T) / (2.0 * N) + jnp.eye(N, dtype=jnp.float32)

    X = jax.random.normal(k_x, (N, num_feature), jnp.float32)

    W1, b1 = _linear_init(k_l1, hidden, num_feature)
    W2, b2 = _linear_init(k_l2, num_class, hidden)

    # Small tiles so the demo exercises a (4 row-tiles x 2 K-steps) grid,
    # including accumulator init/finalize, resident-XW slicing and padding.
    adj = prepare_adjacency(A, row_tile=64, k_tile=128)
    out = gcn_forward(adj, X, W1, b1, W2, b2)
    out = jax.block_until_ready(out)
    assert out.shape == (N, num_class)

    # 1) Strict check vs. a bf16-cast-emulating reference (kernel logic).
    A_bf = A.astype(jnp.bfloat16).astype(jnp.float32)
    xw1_bf = (X @ W1.T).astype(jnp.bfloat16).astype(jnp.float32)
    h_emul = jnp.maximum(A_bf @ xw1_bf + b1, 0.0)
    hw2_bf = (h_emul @ W2.T).astype(jnp.bfloat16).astype(jnp.float32)
    out_emul = A_bf @ hw2_bf + b2
    assert jnp.allclose(out, out_emul, atol=1e-3, rtol=1e-3), \
        "mismatch vs bf16-emulated reference"

    # 2) Loose check vs. the f32 PyTorch-module math (bf16 A => ~1e-2 level).
    h_ref = jnp.maximum((A @ X) @ W1.T + b1, 0.0)
    out_ref = (A @ h_ref) @ W2.T + b2
    assert jnp.allclose(out, out_ref, atol=5e-2, rtol=5e-2), \
        "mismatch vs f32 module reference"

    print("KERNEL_OK")
</pallas_src>

<mosaic_0001>
module attributes {stable_mosaic.version = 11 : i64} {
  func.func @_propagate_kernel(%arg0: i32, %arg1: i32, %arg2: memref<64x128xbf16, #tpu.memory_space<vmem>>, %arg3: memref<256x128xbf16, #tpu.memory_space<vmem>>, %arg4: memref<1x128xf32, #tpu.memory_space<vmem>>, %arg5: memref<64x128xf32, #tpu.memory_space<vmem>>) attributes {dimension_semantics = [#tpu.dimension_semantics<parallel>, #tpu.dimension_semantics<arbitrary>], iteration_bounds = array<i64: 4, 2>, scalar_prefetch = 0 : i64, scratch_operands = 0 : i64, tpu.core_type = #tpu.core_type<tc>, window_params = [{transform_indices = @transform_0, window_bounds = array<i64: 64, 128>}, {pipeline_mode = #tpu.pipeline_mode<synchronous>, transform_indices = @transform_1, window_bounds = array<i64: 256, 128>}, {pipeline_mode = #tpu.pipeline_mode<synchronous>, transform_indices = @transform_2, window_bounds = array<i64: 1, 128>}, {transform_indices = @transform_3, window_bounds = array<i64: 64, 128>}]} {
    %c0_i32 = arith.constant 0 : i32
    %0 = arith.cmpi eq, %arg1, %c0_i32 : i32
    %1 = arith.extui %0 : i1 to i32
    %c0_i32_0 = arith.constant 0 : i32
    %2 = arith.cmpi ne, %1, %c0_i32_0 : i32
    scf.if %2 {
      %cst_8 = arith.constant 0.000000e+00 : f32
      %15 = vector.broadcast %cst_8 : f32 to vector<64x128xf32>
      %c0_9 = arith.constant 0 : index
      %c0_10 = arith.constant 0 : index
      %16 = vector.load %arg5[%c0_9, %c0_10] : memref<64x128xf32, #tpu.memory_space<vmem>>, vector<64x128xf32>
      tpu.vector_store %arg5[%c0_9, %c0_10], %15 {strides = array<i32>} : memref<64x128xf32, #tpu.memory_space<vmem>>, vector<64x128xf32>,
    } else {
    }
    %c128_i32 = arith.constant 128 : i32
    %3 = arith.muli %arg1, %c128_i32 : i32
    %4 = tpu.assume_multiple %3, 128 : i32
    %5 = arith.index_cast %4 : i32 to index
    %c0 = arith.constant 0 : index
    %6 = vector.load %arg3[%5, %c0] : memref<256x128xbf16, #tpu.memory_space<vmem>>, vector<128x128xbf16>
    %c0_1 = arith.constant 0 : index
    %c0_2 = arith.constant 0 : index
    %7 = vector.load %arg5[%c0_1, %c0_2] : memref<64x128xf32, #tpu.memory_space<vmem>>, vector<64x128xf32>
    %c0_3 = arith.constant 0 : index
    %c0_4 = arith.constant 0 : index
    %8 = vector.load %arg2[%c0_3, %c0_4] : memref<64x128xbf16, #tpu.memory_space<vmem>>, vector<64x128xbf16>
    %cst = arith.constant dense<0.000000e+00> : vector<64x128xf32>
    %9 = tpu.matmul %8, %6, %cst {dimension_numbers = #tpu.dot_dimension_numbers<[1], [0], [0], [1], [0, 0, 1, 1], [], []>} : vector<64x128xbf16>, vector<128x128xbf16>, vector<64x128xf32> -> vector<64x128xf32>
    %10 = arith.addf %7, %9 : vector<64x128xf32>
    %c0_5 = arith.constant 0 : index
    %c0_6 = arith.constant 0 : index
    %11 = vector.load %arg5[%c0_5, %c0_6] : memref<64x128xf32, #tpu.memory_space<vmem>>, vector<64x128xf32>
    tpu.vector_store %arg5[%c0_5, %c0_6], %10 {strides = array<i32>} : memref<64x128xf32, #tpu.memory_space<vmem>>, vector<64x128xf32>,
    %c1_i32 = arith.constant 1 : i32
    %12 = arith.cmpi eq, %arg1, %c1_i32 : i32
    %13 = arith.extui %12 : i1 to i32
    %c0_i32_7 = arith.constant 0 : i32
    %14 = arith.cmpi ne, %13, %c0_i32_7 : i32
    scf.if %14 {
      %c0_8 = arith.constant 0 : index
      %c0_9 = arith.constant 0 : index
      %15 = vector.load %arg5[%c0_8, %c0_9] : memref<64x128xf32, #tpu.memory_space<vmem>>, vector<64x128xf32>
      %c0_10 = arith.constant 0 : index
      %c0_11 = arith.constant 0 : index
      %16 = vector.load %arg4[%c0_10, %c0_11] : memref<1x128xf32, #tpu.memory_space<vmem>>, vector<1x128xf32>
      %17 = vector.broadcast %16 : vector<1x128xf32> to vector<64x128xf32>
      %18 = arith.addf %15, %17 : vector<64x128xf32>
      %cst_12 = arith.constant 0.000000e+00 : f32
      %19 = vector.broadcast %cst_12 : f32 to vector<64x128xf32>
      %20 = arith.maximumf %18, %19 : vector<64x128xf32>
      %c0_13 = arith.constant 0 : index
      %c0_14 = arith.constant 0 : index
      %21 = vector.load %arg5[%c0_13, %c0_14] : memref<64x128xf32, #tpu.memory_space<vmem>>, vector<64x128xf32>
      tpu.vector_store %arg5[%c0_13, %c0_14], %20 {strides = array<i32>} : memref<64x128xf32, #tpu.memory_space<vmem>>, vector<64x128xf32>,
    } else {
    }
    return
  }
  func.func @transform_0(%arg0: i32, %arg1: i32) -> (i32, i32) {
    %c0_i32 = arith.constant 0 : i32
    return %arg0, %arg1 : i32, i32
  }
  func.func @transform_1(%arg0: i32, %arg1: i32) -> (i32, i32) {
    %c0_i32 = arith.constant 0 : i32
    %c0_i32_0 = arith.constant 0 : i32
    %c0_i32_1 = arith.constant 0 : i32
    return %c0_i32, %c0_i32_0 : i32, i32
  }
  func.func @transform_2(%arg0: i32, %arg1: i32) -> (i32, i32) {
    %c0_i32 = arith.constant 0 : i32
    %c0_i32_0 = arith.constant 0 : i32
    %c0_i32_1 = arith.constant 0 : i32
    return %c0_i32, %c0_i32_0 : i32, i32
  }
  func.func @transform_3(%arg0: i32, %arg1: i32) -> (i32, i32) {
    %c0_i32 = arith.constant 0 : i32
    %c0_i32_0 = arith.constant 0 : i32
    return %arg0, %c0_i32 : i32, i32
  }
}

</mosaic_0001>

<bundles_post_ra>
// kernel: tpu_custom_call.1
= control target key start
LH: loop header
LB: loop body
LE: loop exit
PB: predicated region body
PF: predicated region fallthrough
CT: control target
= control target key end

     0   :  { %s1353_s0 = inlined_call_operand.hbm [shape: bf16[256,256], index: 0, kind: input, shape index: {}]   ;;  %s1354_s1 = inlined_call_operand.hbm [shape: bf16[256,128], index: 1, kind: input, shape index: {}]   ;;  %s1355_s2 = inlined_call_operand.vmem [shape: f32[1,128], index: 2, kind: input, shape index: {}]   ;;  %s1356_s3 = inlined_call_operand.hbm [shape: f32[256,128], index: 3, kind: output, shape index: {}]  }
   0x1   :  { %1370 = sst [smem:[#allocation16_spill]] %s1354_s1 }
   0x2   :  { %8 = vsyncpa [#allocation3], 0 }
   0x3   :  { %10 = vsyncpa [#allocation3 + $0x1], 0 }
   0x4   :  { %11 = vsyncpa [#allocation6], 0 }
   0x5   :  { %12 = vsyncpa [#allocation4], 0 }
   0x6   :  { %14 = vsyncpa [#allocation4 + $0x1], 0  ;;  %s1015_s12 = smov 0   ;;  %s1017_s13 = smov 0  }
   0x7   :  { %s1019_s14 = smov 0   ;;  %s1021_s15 = smov 0  }
   0x8   :  { %s1023_s16 = smov 0   ;;  %s1025_s17 = smov 0  }
   0x9   :  { %s1027_s18 = smov 0   ;;  %s1029_s19 = smov 0  }
   0xa   :  { %s1031_s20 = smov 0   ;;  %s1033_s21 = smov 0  }
   0xb   :  { %s1035_s22 = smov 0  }
   0xc LB: > { %1371 = sst [smem:[#allocation11_spill]] %s944_s12  ;;  %s580_s23 = sadd.s32 4294967295, %s984_s22   ;;  %s984_s22 = sphi %s1035_s22, %s20_s22   ;;  %s980_s21 = sphi %s1033_s21, %s1407_s21   ;;  %s976_s20 = sphi %s1031_s20, %s1398_s20   ;;  %s972_s19 = sphi %s1029_s19, %s1406_s19   ;;  %s968_s18 = sphi %s1027_s18, %s1397_s18   ;;  %s964_s17 = sphi %s1025_s17, %s1405_s17   ;;  %s960_s16 = sphi %s1023_s16, %s1404_s16   ;;  %s956_s15 = sphi %s1021_s15, %s1403_s15   ;;  %s952_s14 = sphi %s1019_s14, %s1402_s14   ;;  %s948_s13 = sphi %s1017_s13, %s1401_s13   ;;  %s944_s12 = sphi %s1015_s12, %s1400_s12  }
   0xd   : > { %1372 = sst [smem:[#allocation12_spill]] %s976_s20  ;;  %s581_s24 = sadd.s32 4294967294, %s984_s22  }
   0xe   : > { %p48_p0 = scmp.ne.s32.totalorder %s964_s17, %s960_s16  ;;  %p49_p1 = scmp.eq.s32.totalorder %s984_s22, 0 }
   0xf   : > { %p54_p2 = scmp.ne.s32.totalorder %s960_s16, %s956_s15  ;;  %p1075_p3 = scmp.eq.s32.totalorder %s580_s23, 0 }
  0x10   : > { %p1080_p4 = por %p49_p1, %p48_p0  ;;  %p119_p5 = scmp.ne.s32.totalorder %s952_s14, %s948_s13 }
  0x11   : > { %s1373_s26 = scalar_select %p1075_p3, 1, 0 }
  0x12   : > { %p1088_p6 = por %p1075_p3, %p54_p2  ;;  %p120_p7 = scmp.eq.s32.totalorder %s580_s23, 7 }
  0x13   : > { %p125_p8 = scmp.ne.s32.totalorder %s948_s13, %s944_s12  ;;  %p126_p9 = scmp.eq.s32.totalorder %s581_s24, 7 }
  0x14   : > { %s1375_s29 = scalar_select %p1088_p6, 1, 0 }
  0x15   : > { %p1094_p10 = por %p120_p7, %p119_p5  ;;  %p582_p11 = scmp.ge.s32.totalorder %s984_s22, 1 }
  0x16   : > { %p1099_p12 = por %p126_p9, %p125_p8  ;;  %p133_p13 = scmp.lt.s32.totalorder %s984_s22, 9 }
  0x17   : > { %s1376_s30 = scalar_select %p1094_p10, 1, 0 }
  0x18   : > { %s1377_s4 = scalar_select %p1099_p12, 1, 0 }
  0x19   : > { %p1104_p0 = pnand %p582_p11, %p133_p13  ;;  %s986_s6 = smov [#allocation5]  }
  0x1a   : > { %1378 = sst [smem:[#allocation13_spill]] %s1377_s4  ;;  %s145_s7 = sshll.u32 %s986_s6, 4  ;;  %s146_s7 = int_to_ptr.vmem [resolvable:$true] %s145_s7 }
  0x1b   : > { %s1379_s5 = scalar_select %p1104_p0, 1, 0 }
  0x1c   : > { %p677_p1 = pneg %p1104_p0  ;;  %p690_p2 = scmp.lt.s32.totalorder %s984_s22, 8 }
  0x1d   : > { %s1382_s1 = sld [smem:[#allocation16_spill]] }
  0x1e   : > { %p1113_p5 = pnand %p677_p1, %p1075_p3  ;;  %p1119_p7 = pnand %p690_p2, %p1080_p4 }
  0x20   : > { %s1381_s9 = scalar_select %p1119_p7, 1, 0 }
  0x21   : > { %p802_p9 = pneg %p1113_p5 }
  0x23   : > { %s800_s15 = scalar_lea.hbm %s1382_s1, 2048 }
  0x24   : > { %p801_p8 = scmp.ne.s32.totalorder %s1382_s1, %s800_s15  ;;  %p807_p1 = scmp.lt.u32.totalorder %s800_s15, %s1382_s1 }
  0x26   : > { %p803_p11 = pnand %p802_p9, %p801_p8 }
  0x28   : > { %p804_p13 = pneg %p803_p11 }
  0x2a   : > { %p809_p4 = pnand %p807_p1, %p804_p13 }
  0x2c   : > { %812 = shalt.err (!%p809_p4)
}
  0x2d   : > { %s813_s28 = scalar_lea.vmem %s146_s7, 2048  ;;  %p821_p3 = scmp.lt.s32.totalorder %s146_s7, %s146_s7 }
  0x2e   : > { %p814_p2 = scmp.ne.s32.totalorder %s146_s7, %s813_s28  ;;  %p822_p6 = scmp.lt.s32.totalorder %s813_s28, %s813_s28 }
  0x30   : > { %p816_p12 = pnand %p814_p2, %p802_p9  ;;  %p823_p0 = por %p822_p6, %p821_p3 }
  0x32   : > { %p817_p10 = pneg %p816_p12 }
  0x34   : > { %p824_p7 = pnand %p823_p0, %p817_p10 }
  0x36   : > { %827 = shalt.err (!%p824_p7)
}
  0x37   : > { %s1364_s10 = smov 64   ;;  %s1365_s25 = smov 4  }
  0x38   : > { %680 = dma.hbm_to_vmem [thread:$0]  (!%p1113_p5), %s1382_s1, 2048, %s146_s7, [#allocation6], %s1364_s10, %s1364_s10, %s1365_s25  }
  0x39   : > { %s29_s23 = sadd.s32 1, %s976_s20  ;;  %s32_s24 = sadd.s32 1, %s980_s21 }
  0x3a   : > { %p30_p3 = scmp.ge.s32.totalorder %s29_s23, 2  ;;  %s162_s6 = sand.u32 1, %s964_s17  }
  0x3b   : > { %s585_s28 = sshll.u32 %s162_s6, 5  ;;  %s615_s27 = sshll.u32 %s980_s21, 4 }
  0x3c   : > { %s1409_s23 = smov (%p30_p3, %s29_s23), 0  ;;  %s1411_s24 = smov (!%p30_p3, %s32_s24), %s980_s21 }
  0x3d   : > { %1383 = sst [smem:[#allocation14_spill]] %s1409_s23  ;;  %s37_s8 = ssub.s32 %s976_s20, %s1409_s23 }
  0x3e   : > { %p34_p6 = scmp.ge.s32.totalorder %s1411_s24, 4  ;;  %s172_s4 = sadd.s32 %s976_s20, %s615_s27 }
  0x3f   : > { %s166_s7 = scalar_lea.vmem [#allocation2], %s585_s28  ;;  %s588_s15 = sshll.u32 %s172_s4, 6 }
  0x40   : > { %s175_s11 = sshll.u32 %s166_s7, 4  ;;  %s1413_s24 = smov (%p34_p6, %s1411_s24), 0  ;;  %s1154_s11 = int_to_ptr.vmem [resolvable:$true] %s175_s11 }
  0x41   : > { %1384 = sst [smem:[#allocation15_spill]] %s1413_s24  ;;  %s36_s10 = ssub.s32 %s980_s21, %s1413_s24 }
  0x42   : > { %s1161_s12 = scalar_lea.hbm %s1353_s0, %s588_s15  ;;  %s38_s27 = sor.u32 %s37_s8, %s36_s10 }
  0x43   : > { %p107_p10 = scmp.eq.s32.totalorder %s36_s10, 0  ;;  %p39_p12 = scmp.eq.s32.totalorder %s38_s27, 0 }
  0x44   : > { %s1385_s28 = sadd.s32 1, %s952_s14  ;;  %s1386_s23 = sadd.s32 1, %s964_s17 }
  0x45   : > { %s1166_s7 = scalar_select %p107_p10, %s952_s14, %s1385_s28  }
  0x46   : > { %s1171_s4 = scalar_select %p39_p12, %s964_s17, %s1386_s23  }
  0x47   : > { %s1173_s20 = scalar_lea.sflag [#allocation3], %s162_s6  ;;  %s828_s24 = scalar_lea.hbm %s1161_s12, 512 }
  0x48   : > { %p829_p0 = scmp.ne.s32.totalorder %s1161_s12, %s828_s24  ;;  %p1387_p5 = scmp.ne.s32.totalorder %s1381_s9, 0 }
  0x49   : > { %s833_s10 = scalar_lea.hbm %s1353_s0, 4096  ;;  %p834_p11 = scmp.lt.u32.totalorder %s1161_s12, %s1353_s0 }
  0x4a   : > { %p830_p7 = pneg %p1387_p5  ;;  %p835_p13 = scmp.lt.u32.totalorder %s833_s10, %s828_s24 }
  0x4b   : > { %p837_p4 = scmp.lt.u32.totalorder %s828_s24, %s1161_s12 }
  0x4c   : > { %p831_p8 = pnand %p830_p7, %p829_p0  ;;  %p836_p1 = por %p835_p13, %p834_p11 }
  0x4e   : > { %p832_p9 = pneg %p831_p8  ;;  %p838_p2 = por %p837_p4, %p836_p1 }
  0x50   : > { %p839_p3 = pnand %p838_p2, %p832_p9 }
  0x52   : > { %842 = shalt.err (!%p839_p3)
}
  0x53   : > { %s843_s23 = scalar_lea.vmem %s1154_s11, 512  ;;  %s989_s6 = smov [#allocation2]  }
  0x54   : > { %p844_p6 = scmp.ne.s32.totalorder %s1154_s11, %s843_s23  ;;  %s848_s27 = sshll.u32 %s989_s6, 4  ;;  %s849_s27 = int_to_ptr.vmem [resolvable:$false] %s848_s27 }
  0x55   : > { %s850_s28 = scalar_lea.vmem %s849_s27, 1024  ;;  %p851_p0 = scmp.lt.s32.totalorder %s1154_s11, %s849_s27 }
  0x56   : > { %p846_p10 = pnand %p844_p6, %p830_p7  ;;  %p852_p8 = scmp.lt.s32.totalorder %s850_s28, %s843_s23 }
  0x58   : > { %p847_p12 = pneg %p846_p10  ;;  %p853_p11 = por %p852_p8, %p851_p0 }
  0x5a   : > { %p854_p13 = pnand %p853_p11, %p847_p12 }
  0x5c   : > { %857 = shalt.err (!%p854_p13)
}
  0x5d   : > { %s990_s24 = smov 128   ;;  %s1388_s1 = smov 4  }
  0x5e   : > { %s1389_s25 = smov 64   ;;  %p1390_p7 = scmp.ne.s32.totalorder %s1379_s5, 0 }
  0x5f   : > { %684 = dma.hbm_to_vmem [thread:$0]  (!%p1387_p5), %s1161_s12, 512, %s1154_s11, %s1173_s20, %s990_s24, %s1389_s25, %s1388_s1  }
  0x60   : > { %187 = sbr.rel (%p1390_p7) target bundleno = 410 (0x19a), region = 32  ;;  %s189_s10 = sand.u32 (!%p1390_p7), 1, %s960_s16  }
  0x61   : > { %s590_s8 = sshll.u32 (!%p1390_p7), %s189_s10, 5  ;;  %s190_s15 = scalar_lea.sflag (!%p1390_p7), [#allocation3], %s189_s10 }
  0x62   : > { %s1206_s23 = scalar_lea.vmem (!%p1390_p7), [#allocation2], %s590_s8  ;;  %p1391_p9 = scmp.ne.s32.totalorder (!%p1390_p7), %s1375_s29, 0 }
  0x67   : > { %931 = dma.done.wait (%p1391_p9), %s190_s15, 512  }
  0x68   : > { %933 = vsyncadd (%p1391_p9), %s190_s15, 4294966784  ;;  %p1392_p1 = scmp.ne.s32.totalorder %s1373_s26, 0 }
  0x6a   : > { %935 = dma.done.wait (%p1392_p1), [#allocation6], 2048  }
  0x6b   : > { %937 = vsyncadd (%p1392_p1), [#allocation6], 4294965248  ;;  %s217_s12 = sand.u32 1, %s948_s13   ;;  %p593_p5 = scmp.ne.s32.totalorder %s968_s18, 0 }
  0x6c   : > { %s592_s20 = sshll.u32 %s217_s12, 6  ;;  %v991_v0 = vmov (!%p593_p5), 0.0  }
  0x6d   : > { %s1219_s5 = scalar_lea.vmem [#allocation7], %s592_s20  ;;  %226 = sbr.rel (%p593_p5) target bundleno = 116 (0x74), region = 44 }
  0x6e   : > { %227 = vst [vmem:[%s1219_s5] sm:$0xff] (!%p593_p5), %v991_v0  ;;  %228 = vst [vmem:[%s1219_s5 + $0x8] sm:$0xff] (!%p593_p5), %v991_v0 }
  0x6f   : > { %229 = vst [vmem:[%s1219_s5 + $0x10] sm:$0xff] (!%p593_p5), %v991_v0  ;;  %230 = vst [vmem:[%s1219_s5 + $0x18] sm:$0xff] (!%p593_p5), %v991_v0 }
  0x70   : > { %231 = vst [vmem:[%s1219_s5 + $0x20] sm:$0xff] (!%p593_p5), %v991_v0  ;;  %232 = vst [vmem:[%s1219_s5 + $0x28] sm:$0xff] (!%p593_p5), %v991_v0 }
  0x71   : > { %233 = vst [vmem:[%s1219_s5 + $0x30] sm:$0xff] (!%p593_p5), %v991_v0  ;;  %234 = vst [vmem:[%s1219_s5 + $0x38] sm:$0xff] (!%p593_p5), %v991_v0 }
  0x74 PF: > { %s594_s26 = sshll.u32 %s968_s18, 7  ;;  %v796_v1 = vld [vmem:[%s1206_s23] sm:$0xff]   ;;  %v797_v2 = vld [vmem:[%s1206_s23 + $0x10] sm:$0xff]   ;;  %v798_v11 = vld [vmem:[%s1206_s23 + $0x8] sm:$0xff]   ;;  %p608_p4 = scmp.ne.s32.totalorder %s968_s18, 1 }
  0x75   : > { %s236_s29 = sshra.s32 %s594_s26, 3  ;;  %645 = vmatprep.mubr.bf16.mxu0 %v796_v1  ;;  %649 = vmatprep.mubr.bf16.mxu1 %v797_v2  ;;  %v799_v12 = vld [vmem:[%s1206_s23 + $0x18] sm:$0xff]   ;;  %v256_v15 = vld [vmem:[%s1219_s5] sm:$0xff]  ;;  %v257_v25 = vld [vmem:[%s1219_s5 + $0x8] sm:$0xff] }
  0x76   : > { %s595_s9 = sshll.u32 %s236_s29, 2  ;;  %v258_v13 = vld [vmem:[%s1219_s5 + $0x10] sm:$0xff]  ;;  %v259_v19 = vld [vmem:[%s1219_s5 + $0x18] sm:$0xff]  ;;  %v609_v38 = vld [vmem:[%s1355_s2] ss:$0 sm:$0xff] (!%p608_p4) }
  0x77   : > { %s1233_s11 = scalar_lea.vmem [#allocation5], %s595_s9  ;;  %v260_v16 = vld [vmem:[%s1219_s5 + $0x20] sm:$0xff]  ;;  %v261_v26 = vld [vmem:[%s1219_s5 + $0x28] sm:$0xff] }
  0x78   : > { %v788_v3 = vld [vmem:[%s1233_s11] sm:$0xff]   ;;  %v789_v4 = vld [vmem:[%s1233_s11 + $0x8] sm:$0xff]   ;;  %v790_v5 = vld [vmem:[%s1233_s11 + $0x10] sm:$0xff]  }
  0x79   : > { %629 = vmatprep.subr.bf16.mxu0 %v788_v3  ;;  %653 = vmatprep.subr.bf16.mxu1 %v788_v3  ;;  %v791_v6 = vld [vmem:[%s1233_s11 + $0x18] sm:$0xff]   ;;  %v792_v7 = vld [vmem:[%s1233_s11 + $0x20] sm:$0xff]   ;;  %v793_v8 = vld [vmem:[%s1233_s11 + $0x28] sm:$0xff]  }
  0x7a   : > { %630 = vmatpush3.bf16.msra.mxu0 %v788_v3  ;;  %661 = vmatpush3.bf16.msra.mxu1 %v788_v3  ;;  %v794_v9 = vld [vmem:[%s1233_s11 + $0x30] sm:$0xff]   ;;  %v795_v10 = vld [vmem:[%s1233_s11 + $0x38] sm:$0xff]  }
  0x7b   : > { %631 = vmatprep.subr.bf16.mxu0 %v789_v4  ;;  %654 = vmatprep.subr.bf16.mxu1 %v789_v4  ;;  %v262_v14 = vld [vmem:[%s1219_s5 + $0x30] sm:$0xff]  ;;  %v263_v20 = vld [vmem:[%s1219_s5 + $0x38] sm:$0xff] }
  0x7e   : > { %632 = vmatpush3.bf16.msra.mxu0 %v789_v4  ;;  %662 = vmatpush3.bf16.msra.mxu1 %v789_v4 }
  0x7f   : > { %633 = vmatprep.subr.bf16.mxu0 %v790_v5  ;;  %655 = vmatprep.subr.bf16.mxu1 %v790_v5 }
  0x82   : > { %634 = vmatpush3.bf16.msra.mxu0 %v790_v5  ;;  %663 = vmatpush3.bf16.msra.mxu1 %v790_v5 }
  0x83   : > { %635 = vmatprep.subr.bf16.mxu0 %v791_v6  ;;  %656 = vmatprep.subr.bf16.mxu1 %v791_v6 }
  0x86   : > { %636 = vmatpush3.bf16.msra.mxu0 %v791_v6  ;;  %664 = vmatpush3.bf16.msra.mxu1 %v791_v6 }
  0x87   : > { %637 = vmatprep.subr.bf16.mxu0 %v792_v7  ;;  %657 = vmatprep.subr.bf16.mxu1 %v792_v7 }
  0x8a   : > { %638 = vmatpush3.bf16.msra.mxu0 %v792_v7  ;;  %665 = vmatpush3.bf16.msra.mxu1 %v792_v7 }
  0x8b   : > { %639 = vmatprep.subr.bf16.mxu0 %v793_v8  ;;  %658 = vmatprep.subr.bf16.mxu1 %v793_v8 }
  0x8e   : > { %640 = vmatpush3.bf16.msra.mxu0 %v793_v8  ;;  %666 = vmatpush3.bf16.msra.mxu1 %v793_v8 }
  0x8f   : > { %641 = vmatprep.subr.bf16.mxu0 %v794_v9  ;;  %659 = vmatprep.subr.bf16.mxu1 %v794_v9 }
  0x92   : > { %642 = vmatpush3.bf16.msra.mxu0 %v794_v9  ;;  %667 = vmatpush3.bf16.msra.mxu1 %v794_v9 }
  0x93   : > { %643 = vmatprep.subr.bf16.mxu0 %v795_v10  ;;  %660 = vmatprep.subr.bf16.mxu1 %v795_v10 }
  0x96   : > { %644 = vmatpush3.bf16.msra.mxu0 %v795_v10  ;;  %668 = vmatpush3.bf16.msra.mxu1 %v795_v10 }
  0x99   : > { %646 = vmatmul.mubr.bf16.vlgmr.msra.gmra.mrb[0].mxu0 %v798_v11  ;;  %650 = vmatmul.mubr.bf16.vlgmr.msra.gmra.mrb[0].mxu1 %v799_v12 }
 0x16c   : > { %v647_v17 = vpop.f32.mrb[0].mxu0  ;;  %v651_v18 = vpop.f32.mrb[0].mxu1  ;;  %428 = sbr.rel (%p608_p4) target bundleno = 384 (0x180), region = 48 }
 0x16d   : > { %v411_v21 = vadd.f32 %v647_v17, %v258_v13  ;;  %v415_v22 = vadd.f32 %v651_v18, %v262_v14  ;;  %v378_v23 = vpop.f32.mrb[1].mxu0  ;;  %v394_v24 = vpop.f32.mrb[1].mxu1 }
 0x16e   : > { %v409_v27 = vadd.f32 %v378_v23, %v256_v15  ;;  %v413_v28 = vadd.f32 %v394_v24, %v260_v16  ;;  %v648_v29 = vpop.f32.mrb[2].mxu0  ;;  %v652_v30 = vpop.f32.mrb[2].mxu1 }
 0x16f   : > { %419 = vst [vmem:[%s1219_s5 + $0x10] sm:$0xff] %v411_v21  ;;  %423 = vst [vmem:[%s1219_s5 + $0x30] sm:$0xff] %v415_v22  ;;  %v412_v31 = vadd.f32 %v648_v29, %v259_v19  ;;  %v416_v32 = vadd.f32 %v652_v30, %v263_v20  ;;  %v381_v33 = vpop.f32.mrb[3].mxu0  ;;  %v397_v34 = vpop.f32.mrb[3].mxu1 }
 0x170   : > { %417 = vst [vmem:[%s1219_s5] sm:$0xff] %v409_v27  ;;  %421 = vst [vmem:[%s1219_s5 + $0x20] sm:$0xff] %v413_v28  ;;  %v410_v35 = vadd.f32 %v381_v33, %v257_v25  ;;  %v414_v36 = vadd.f32 %v397_v34, %v261_v26 }
 0x171   : > { %420 = vst [vmem:[%s1219_s5 + $0x18] sm:$0xff] %v412_v31  ;;  %424 = vst [vmem:[%s1219_s5 + $0x38] sm:$0xff] %v416_v32 }
 0x172   : > { %418 = vst [vmem:[%s1219_s5 + $0x8] sm:$0xff] %v410_v35  ;;  %422 = vst [vmem:[%s1219_s5 + $0x28] sm:$0xff] %v414_v36 }
 0x176   : > { %v431_v42 = vld [vmem:[%s1219_s5 + $0x10] sm:$0xff] }
 0x177   : > { %v429_v37 = vld [vmem:[%s1219_s5] sm:$0xff]  ;;  %v446_v45 = vadd.f32 %v609_v38, %v431_v42  ;;  %v435_v49 = vld [vmem:[%s1219_s5 + $0x30] sm:$0xff] }
 0x178   : > { %v444_v40 = vadd.f32 %v609_v38, %v429_v37  ;;  %v432_v43 = vld [vmem:[%s1219_s5 + $0x18] sm:$0xff]  ;;  %v433_v44 = vld [vmem:[%s1219_s5 + $0x20] sm:$0xff]  ;;  %v450_v54 = vadd.f32 %v609_v38, %v435_v49 }
 0x179   : > { %v430_v39 = vld [vmem:[%s1219_s5 + $0x8] sm:$0xff]  ;;  %v447_v46 = vadd.f32 %v609_v38, %v432_v43  ;;  %v448_v47 = vadd.f32 %v609_v38, %v433_v44  ;;  %v436_v50 = vld [vmem:[%s1219_s5 + $0x38] sm:$0xff]  ;;  %v454_v55 = vmax.f32 %v446_v45, 0.0 }
 0x17a   : > { %v445_v41 = vadd.f32 %v609_v38, %v430_v39  ;;  %v434_v48 = vld [vmem:[%s1219_s5 + $0x28] sm:$0xff]  ;;  %v452_v51 = vmax.f32 %v444_v40, 0.0  ;;  %v451_v58 = vadd.f32 %v609_v38, %v436_v50  ;;  %v458_v60 = vmax.f32 %v450_v54, 0.0 }
 0x17b   : > { %v449_v53 = vadd.f32 %v609_v38, %v434_v48  ;;  %v455_v56 = vmax.f32 %v447_v46, 0.0  ;;  %v456_v57 = vmax.f32 %v448_v47, 0.0  ;;  %462 = vst [vmem:[%s1219_s5 + $0x10] sm:$0xff] %v454_v55 }
 0x17c   : > { %v453_v52 = vmax.f32 %v445_v41, 0.0  ;;  %460 = vst [vmem:[%s1219_s5] sm:$0xff] %v452_v51  ;;  %v459_v61 = vmax.f32 %v451_v58, 0.0  ;;  %466 = vst [vmem:[%s1219_s5 + $0x30] sm:$0xff] %v458_v60 }
 0x17d   : > { %v457_v59 = vmax.f32 %v449_v53, 0.0  ;;  %463 = vst [vmem:[%s1219_s5 + $0x18] sm:$0xff] %v455_v56  ;;  %464 = vst [vmem:[%s1219_s5 + $0x20] sm:$0xff] %v456_v57 }
 0x17e   : > { %461 = vst [vmem:[%s1219_s5 + $0x8] sm:$0xff] %v453_v52  ;;  %467 = vst [vmem:[%s1219_s5 + $0x38] sm:$0xff] %v459_v61 }
 0x17f   : > { %465 = vst [vmem:[%s1219_s5 + $0x28] sm:$0xff] %v457_v59 }
 0x180 PF: > { %s616_s18 = sshll.u32 %s972_s19, 10  ;;  %s482_s25 = sshll.u32 %s1219_s5, 4  ;;  %s1288_s25 = int_to_ptr.vmem [resolvable:$true] %s482_s25 }
 0x181   : > { %s1285_s1 = scalar_lea.hbm %s1356_s3, %s616_s18  ;;  %s1292_s10 = scalar_lea.sflag [#allocation4], %s217_s12 }
 0x182   : > { %s858_s8 = scalar_lea.vmem %s1288_s25, 1024  ;;  %p1393_p3 = scmp.ne.s32.totalorder %s1376_s30, 0 }
 0x183   : > { %p859_p2 = scmp.ne.s32.totalorder %s1288_s25, %s858_s8  ;;  %s992_s19 = smov [#allocation7]  }
 0x184   : > { %s862_s15 = sshll.u32 %s992_s19, 4  ;;  %s863_s15 = int_to_ptr.vmem [resolvable:$false] %s862_s15 }
 0x185   : > { %p860_p6 = pnand %p859_p2, %p1393_p3  ;;  %s864_s23 = scalar_lea.vmem %s863_s15, 2048 }
 0x186   : > { %p865_p12 = scmp.lt.s32.totalorder %s1288_s25, %s863_s15  ;;  %p866_p0 = scmp.lt.s32.totalorder %s864_s23, %s858_s8 }
 0x187   : > { %p861_p10 = pneg %p860_p6 }
 0x188   : > { %p867_p8 = por %p866_p0, %p865_p12 }
 0x18a   : > { %p868_p11 = pnand %p867_p8, %p861_p10 }
 0x18c   : > { %871 = shalt.err (!%p868_p11)
}
 0x18d   : > { %s872_s12 = scalar_lea.hbm %s1285_s1, 1024  ;;  %s876_s26 = scalar_lea.hbm %s1356_s3, 4096 }
 0x18e   : > { %p873_p13 = scmp.ne.s32.totalorder %s1285_s1, %s872_s12  ;;  %p877_p1 = scmp.lt.u32.totalorder %s1285_s1, %s1356_s3 }
 0x18f   : > { %p878_p5 = scmp.lt.u32.totalorder %s876_s26, %s872_s12  ;;  %p880_p2 = scmp.lt.u32.totalorder %s872_s12, %s1285_s1 }
 0x190   : > { %p874_p7 = pnand %p873_p13, %p1393_p3 }
 0x191   : > { %p879_p4 = por %p878_p5, %p877_p1 }
 0x192   : > { %p875_p9 = pneg %p874_p7 }
 0x193   : > { %p881_p6 = por %p880_p2, %p879_p4 }
 0x195   : > { %p882_p10 = pnand %p881_p6, %p875_p9 }
 0x197   : > { %885 = shalt.err (!%p882_p10)
}
 0x198   : > { %s993_s11 = smov 128   ;;  %s994_s6 = smov 8  }
 0x199   : > { %675 = dma.vmem_to_hbm [thread:$0]  (%p1393_p3), %s1288_s25, 1024, %s1285_s1, %s1292_s10, %s993_s11, %s993_s11, %s994_s6  }
 0x19a PF: > { %s1394_s27 = sld [smem:[#allocation11_spill]]  ;;  %s1395_s18 = sld [smem:[#allocation13_spill]] }
 0x19b   : > { %p692_p12 = scmp.ge.s32.totalorder %s984_s22, 2 }
 0x1a0   : > { %s497_s28 = sand.u32 1, %s1394_s27   ;;  %p1396_p0 = scmp.ne.s32.totalorder %s1395_s18, 0 }
 0x1a1   : > { %s498_s24 = scalar_lea.sflag [#allocation4], %s497_s28 }
 0x1a2   : > { %p686_p8 = pnand %p692_p12, %p1396_p0 }
 0x1a4   : > { %939 = dma.done.wait (!%p686_p8), %s498_s24, 1024  }
 0x1a5   : > { %941 = vsyncadd (!%p686_p8), %s498_s24, 4294966272  ;;  %s20_s22 = sadd.s32 1, %s984_s22   ;;  %s1397_s18 = sld [smem:[#allocation12_spill]] }
 0x1a6   : > { %p17_p11 = scmp.ge.s32.totalorder %s20_s22, 10   ;;  %s1398_s20 = sld [smem:[#allocation14_spill]] }
 0x1a7   : > { %s1399_s30 = sld [smem:[#allocation15_spill]]  ;;  %s1400_s12 = smov %s948_s13 }
 0x1a8   : > { %s1401_s13 = smov %s952_s14  ;;  %s1402_s14 = smov %s1166_s7 }
 0x1a9   : > { %s1403_s15 = smov %s960_s16  ;;  %s1404_s16 = smov %s964_s17 }
 0x1aa   : > { %s1405_s17 = smov %s1171_s4  ;;  %s1406_s19 = smov %s980_s21 }
 0x1ab   :  { %19 = sbr.rel (!%p17_p11) target bundleno = 12 (0xc), region = 90 }
 0x1ad   : > { %s1407_s21 = smov %s1399_s30 }
 0x1b2   :  { %503 = vsyncpa [#allocation3], 1 }
 0x1b3   :  { %505 = vsyncpa [#allocation3 + $0x1], 1 }
 0x1b4   :  { %506 = vsyncpa [#allocation6], 1 }
 0x1b5   :  { %507 = vsyncpa [#allocation4], 1 }
 0x1b6   :  { %509 = vsyncpa [#allocation4 + $0x1], 1 }

</bundles_post_ra>
